<compile_context>
chip_gen: v6e
topology: v6e:2x2x1
jax: 0.10.0
libtpu: 0.0.40
codegen_flags: <defaults>
</compile_context>

<pallas_src>
import jax
import jax.numpy as jnp
from jax.experimental import pallas as pl
from jax.experimental.pallas import tpu as pltpu


def _chomp_copy_kernel(x_ref, o_ref):
    # Input block already excludes the chomped tail (slice done by BlockSpec).
    o_ref[...] = x_ref[...]


def _chomp_slice_kernel(x_ref, o_ref):
    # Input block carries the full time axis; drop the tail here.
    L_out = o_ref.shape[-1]
    o_ref[...] = x_ref[:, :L_out]


def _pick_row_tile(M: int, row_bytes: int) -> int:
    """Pick a row-tile TM: either the full M, or a multiple of 8 capped so a
    single input block stays around ~4 MiB (safe for v7x VMEM with default
    scoped limit, large enough to hit ~85% of HBM roofline)."""
    target_block_bytes = 4 * 1024 * 1024
    rows = target_block_bytes // max(row_bytes, 1)
    rows = max(8, min(1024, (rows // 8) * 8))
    if M <= rows:
        return M  # full-dim block is always legal
    return rows   # multiple of 8 -> satisfies the (8, 128) block constraint


def chomp1d(x: jax.Array, chomp_size: int) -> jax.Array:
    """Pallas equivalent of Chomp1d(chomp_size)(x) for x of shape (N, C, L).

    chomp_size must satisfy 0 < chomp_size < L (PyTorch's x[:, :, :-0] returns
    an empty tensor, which is never the intended TCN usage; we reject it).
    """
    N, C, L = x.shape
    assert 0 < chomp_size < L, "chomp_size must be in (0, L)"
    L_out = L - chomp_size
    M = N * C

    x2 = x.reshape(M, L)
    itemsize = jnp.dtype(x.dtype).itemsize

    # If the output time axis is lane-aligned, slice at the BlockSpec level so
    # the chomped tail is never read from HBM. Otherwise read the full row
    # (block last-dim == full array last-dim is always legal) and slice in VMEM.
    spec_level_chomp = (L_out % 128 == 0)
    L_read = L_out if spec_level_chomp else L

    TM = _pick_row_tile(M, L_read * itemsize)
    grid = (pl.cdiv(M, TM),)

    if spec_level_chomp:
        kernel = _chomp_copy_kernel
        in_spec = pl.BlockSpec((TM, L_out), lambda i: (i, 0))
    else:
        kernel = _chomp_slice_kernel
        in_spec = pl.BlockSpec((TM, L), lambda i: (i, 0))

    out_spec = pl.BlockSpec((TM, L_out), lambda i: (i, 0))

    y2 = pl.pallas_call(
        kernel,
        out_shape=jax.ShapeDtypeStruct((M, L_out), x.dtype),
        grid_spec=pltpu.PrefetchScalarGridSpec(
            num_scalar_prefetch=0,
            grid=grid,
            in_specs=[in_spec],
            out_specs=out_spec,
        ),
        compiler_params=pltpu.CompilerParams(
            # Row tiles are independent -> shard across v7x's 2 TCs; neutral
            # on single-TC v5e/v6e.
            dimension_semantics=("parallel",),
        ),
    )(x2)

    return y2.reshape(N, C, L_out)


if __name__ == "__main__":
    key = jax.random.PRNGKey(0)

    # Small shape consistent with the module's (batch, channels, length) input.
    N, C, L = 2, 4, 16
    chomp_size = 3  # e.g. (kernel_size - 1) * dilation padding of a causal conv

    x = jax.random.normal(key, (N, C, L), dtype=jnp.float32)

    y = chomp1d(x, chomp_size)
    y = jax.block_until_ready(y)

    # Reference check against plain JAX slicing (same as PyTorch x[:, :, :-c]).
    y_ref = x[:, :, :-chomp_size]
    assert y.shape == (N, C, L - chomp_size)
    assert y.dtype == x.dtype
    assert jnp.array_equal(y, y_ref)

    # Exercise the lane-aligned fast path (chomp done in the BlockSpec) too.
    L2, chomp2 = 256 + 64, 64  # L_out = 256, a multiple of 128
    x2 = jax.random.normal(jax.random.PRNGKey(1), (N, C, L2), dtype=jnp.float32)
    y2 = jax.block_until_ready(chomp1d(x2, chomp2))
    assert jnp.array_equal(y2, x2[:, :, :-chomp2])

    print("KERNEL_OK")
</pallas_src>

<mosaic_0001>
module attributes {stable_mosaic.version = 11 : i64} {
  func.func @_chomp_slice_kernel(%arg0: i32, %arg1: memref<8x16xf32, #tpu.memory_space<vmem>>, %arg2: memref<8x13xf32, #tpu.memory_space<vmem>>) attributes {dimension_semantics = [#tpu.dimension_semantics<parallel>], iteration_bounds = array<i64: 1>, scalar_prefetch = 0 : i64, scratch_operands = 0 : i64, tpu.core_type = #tpu.core_type<tc>, window_params = [{transform_indices = @transform_0, window_bounds = array<i64: 8, 16>}, {transform_indices = @transform_1, window_bounds = array<i64: 8, 13>}]} {
    %c0 = arith.constant 0 : index
    %c0_0 = arith.constant 0 : index
    %0 = vector.load %arg1[%c0, %c0_0] : memref<8x16xf32, #tpu.memory_space<vmem>>, vector<8x13xf32>
    %c0_1 = arith.constant 0 : index
    %c0_2 = arith.constant 0 : index
    %1 = vector.load %arg2[%c0_1, %c0_2] : memref<8x13xf32, #tpu.memory_space<vmem>>, vector<8x13xf32>
    tpu.vector_store %arg2[%c0_1, %c0_2], %0 {strides = array<i32>} : memref<8x13xf32, #tpu.memory_space<vmem>>, vector<8x13xf32>,
    return
  }
  func.func @transform_0(%arg0: i32) -> (i32, i32) {
    %c0_i32 = arith.constant 0 : i32
    %c0_i32_0 = arith.constant 0 : i32
    return %arg0, %c0_i32 : i32, i32
  }
  func.func @transform_1(%arg0: i32) -> (i32, i32) {
    %c0_i32 = arith.constant 0 : i32
    %c0_i32_0 = arith.constant 0 : i32
    return %arg0, %c0_i32 : i32, i32
  }
}

</mosaic_0001>

<bundles_post_ra>
// kernel: tpu_custom_call.1
= control target key start
LH: loop header
LB: loop body
LE: loop exit
PB: predicated region body
PF: predicated region fallthrough
CT: control target
= control target key end

     0   :  { %6 = vsyncpa [#allocation3], 0  ;;  %s103_s0 = inlined_call_operand.hbm [shape: f32[8,16], index: 0, kind: input, shape index: {}]   ;;  %s104_s1 = inlined_call_operand.hbm [shape: f32[8,13], index: 1, kind: output, shape index: {}]  }
   0x1   :  { %7 = vsyncpa [#allocation4], 0  ;;  %s85_s6 = smov [#allocation2]  }
   0x2   :  { %s14_s7 = sshll.u32 %s85_s6, 4  ;;  %s15_s7 = int_to_ptr.vmem [resolvable:$true] %s14_s7 }
   0x3   :  { %s49_s8 = scalar_lea.vmem %s15_s7, 128  ;;  %p54_p1 = scmp.lt.s32.totalorder %s15_s7, %s15_s7 }
   0x4   :  { %p50_p0 = scmp.ne.s32.totalorder %s15_s7, %s49_s8  ;;  %p55_p2 = scmp.lt.s32.totalorder %s49_s8, %s49_s8 }
   0x6   :  { %p56_p3 = por %p55_p2, %p54_p1 }
   0x8   :  { %p57_p4 = pnand %p56_p3, %p50_p0 }
   0xa   :  { %60 = shalt.err (!%p57_p4)
}
   0xb   :  { %17 = dma.hbm_to_vmem [thread:$0]  %s103_s0, 128, %s15_s7, [#allocation3]  }
   0xc   :  { %81 = dma.done.wait [#allocation3], 128  }
   0xd   :  { %82 = vsyncadd [#allocation3], 4294967168  ;;  %s86_s11 = smov [#allocation5]   ;;  %vm22_vm0 = vcmask 105472   ;;  %v21_v0 = vld [vmem:[#allocation2] sm:$0xff] }
   0xe   :  { %s30_s12 = sshll.u32 %s86_s11, 4  ;;  %23 = vst.msk [vmem:[#allocation5] sm:$0xff] %vm22_vm0, %v21_v0  ;;  %s31_s12 = int_to_ptr.vmem [resolvable:$true] %s30_s12 }
   0xf   :  { %s61_s13 = scalar_lea.vmem %s31_s12, 128  ;;  %p66_p6 = scmp.lt.s32.totalorder %s31_s12, %s31_s12 }
  0x10   :  { %p62_p5 = scmp.ne.s32.totalorder %s31_s12, %s61_s13  ;;  %p67_p7 = scmp.lt.s32.totalorder %s61_s13, %s61_s13 }
  0x12   :  { %p68_p8 = por %p67_p7, %p66_p6 }
  0x14   :  { %p69_p9 = pnand %p68_p8, %p62_p5 }
  0x16   :  { %72 = shalt.err (!%p69_p9)
}
  0x17   :  { %33 = dma.vmem_to_hbm [thread:$0]  %s31_s12, 128, %s104_s1, [#allocation4]  }
  0x18   :  { %83 = dma.done.wait [#allocation4], 128  }
  0x19   :  { %84 = vsyncadd [#allocation4], 4294967168 }
  0x1a   :  { %37 = vsyncpa [#allocation3], 1 }
  0x1b   :  { %38 = vsyncpa [#allocation4], 1 }

</bundles_post_ra>
